<compile_context>
chip_gen: v7x
topology: tpu7x:2x2x1
jax: 0.10.0
libtpu: 0.0.40
codegen_flags: <defaults>
</compile_context>

<pallas_src>
import math

import jax
import jax.numpy as jnp
from jax import lax
from jax.experimental import pallas as pl
from jax.experimental.pallas import tpu as pltpu

# ----------------------------- configuration --------------------------------
T = 8                      # sequence length
INPUT_DIM = 20
STATIC_IN = 16
DYN = INPUT_DIM - STATIC_IN            # 4  -> LSTM input size
HIDDEN = 32                            # LSTM hidden size
STATIC_OUT = 4                         # static MLP output size
OUTPUT_DIM = 3
HEAD_HIDDEN = HIDDEN // 2              # 16
MLP_HIDDEN = 32                        # static_mlp hidden (nn.Linear(16, 32))
LANES = 4 * HIDDEN                     # 128, slab lane width

# --- parameter-slab row offsets (each region starts on an 8-row boundary) ---
R_WIH = 0                              # (DYN, 4H)
R_WHH = 8                              # (HIDDEN, 4H)
R_BL = 40                              # (1, 4H)          b_ih + b_hh
R_W1 = 48                              # (STATIC_IN, MLP_HIDDEN)
R_B1 = 64                              # (1, MLP_HIDDEN)
R_W2 = 72                              # (MLP_HIDDEN, STATIC_OUT)
R_B2 = 104                             # (1, STATIC_OUT)
R_WH1 = 112                            # (HIDDEN + STATIC_OUT, HEAD_HIDDEN)
R_BH1 = 152                            # (1, HEAD_HIDDEN)
R_WH2 = 160                            # (HEAD_HIDDEN, OUTPUT_DIM)  zero-padded to 128 lanes
R_BH2 = 176                            # (1, OUTPUT_DIM)            zero-padded to 128 lanes
SLAB_ROWS = 184                        # multiple of 8

_INV_SQRT2 = 0.7071067811865476


def _gelu(x):
    # PyTorch nn.GELU() default: exact (erf-based) GELU.
    return 0.5 * x * (1.0 + lax.erf(x * _INV_SQRT2))


# ------------------------------- the kernel ---------------------------------
def lstm_generic2_kernel(x_ref, p_ref, out_ref):
    H = HIDDEN

    # ---------------- LSTM weights (static slab slices, cheap vld) ----------
    wih = p_ref[pl.ds(R_WIH, DYN), :]                    # (4, 128)
    whh = p_ref[pl.ds(R_WHH, H), :]                      # (32, 128)
    bl = p_ref[pl.ds(R_BL, 1), :]                        # (1, 128)

    # Hoist the input projection out of the recurrence: one batched matmul.
    dyn = x_ref[:, pl.ds(0, DYN)]                        # (T, 4)
    xproj = jnp.dot(dyn, wih, preferred_element_type=jnp.float32) + bl  # (T,128)

    # ---------------- fully unrolled recurrence (T is static) ---------------
    h = jnp.zeros((1, H), jnp.float32)
    c = jnp.zeros((1, H), jnp.float32)
    hs = []
    for t in range(T):
        gates = xproj[t:t + 1, :] + jnp.dot(
            h, whh, preferred_element_type=jnp.float32)   # (1, 128)
        # Two full-vreg EUP pushes instead of four sub-vreg activations.
        sig = jax.nn.sigmoid(gates)
        tah = jnp.tanh(gates)
        i = sig[:, 0:H]
        f = sig[:, H:2 * H]
        o = sig[:, 3 * H:4 * H]
        g = tah[:, 2 * H:3 * H]
        c = f * c + i * g
        h = o * jnp.tanh(c)
        hs.append(h)
    lstm_out = jnp.concatenate(hs, axis=0)                # (T, H), in-register

    # ---------------- static MLP: Linear -> GELU -> Linear -> GELU ----------
    stat = x_ref[:, pl.ds(DYN, STATIC_IN)]                # (T, 16)
    w1 = p_ref[pl.ds(R_W1, STATIC_IN), pl.ds(0, MLP_HIDDEN)]
    b1 = p_ref[pl.ds(R_B1, 1), pl.ds(0, MLP_HIDDEN)]
    w2 = p_ref[pl.ds(R_W2, MLP_HIDDEN), pl.ds(0, STATIC_OUT)]
    b2 = p_ref[pl.ds(R_B2, 1), pl.ds(0, STATIC_OUT)]
    hid = _gelu(jnp.dot(stat, w1, preferred_element_type=jnp.float32) + b1)
    fnn = _gelu(jnp.dot(hid, w2, preferred_element_type=jnp.float32) + b2)

    # ---------------- head -------------------------------------------------
    # Split the concat([lstm_out, fnn]) @ wh1 into two matmuls to avoid a
    # cross-lane concatenation (same MXU pass count, no XLU shuffle).
    wh1a = p_ref[pl.ds(R_WH1, H), pl.ds(0, HEAD_HIDDEN)]             # (32, 16)
    wh1b = p_ref[pl.ds(R_WH1 + H, STATIC_OUT), pl.ds(0, HEAD_HIDDEN)]  # (4, 16)
    bh1 = p_ref[pl.ds(R_BH1, 1), pl.ds(0, HEAD_HIDDEN)]              # (1, 16)
    z = _gelu(jnp.dot(lstm_out, wh1a, preferred_element_type=jnp.float32)
              + jnp.dot(fnn, wh1b, preferred_element_type=jnp.float32)
              + bh1)                                                  # (T, 16)

    # Final projection against the full 128-lane (zero-padded) wh2/bh2 slab
    # regions so the output store is a full, unmasked vst (lane-dense out).
    wh2 = p_ref[pl.ds(R_WH2, HEAD_HIDDEN), :]             # (16, 128), lanes>=3 are 0
    bh2 = p_ref[pl.ds(R_BH2, 1), :]                       # (1, 128),  lanes>=3 are 0
    out_ref[...] = jnp.dot(z, wh2, preferred_element_type=jnp.float32) + bh2


# ------------------------------- the wrapper ---------------------------------
def pack_params(p):
    """Pack all weights/biases into one (SLAB_ROWS, 128) f32 slab (1 DMA)."""
    slab = jnp.zeros((SLAB_ROWS, LANES), jnp.float32)
    slab = slab.at[R_WIH:R_WIH + DYN, :4 * HIDDEN].set(p["wih_t"])
    slab = slab.at[R_WHH:R_WHH + HIDDEN, :4 * HIDDEN].set(p["whh_t"])
    slab = slab.at[R_BL:R_BL + 1, :4 * HIDDEN].set(p["b_l"])
    slab = slab.at[R_W1:R_W1 + STATIC_IN, :MLP_HIDDEN].set(p["w1"])
    slab = slab.at[R_B1:R_B1 + 1, :MLP_HIDDEN].set(p["b1"])
    slab = slab.at[R_W2:R_W2 + MLP_HIDDEN, :STATIC_OUT].set(p["w2"])
    slab = slab.at[R_B2:R_B2 + 1, :STATIC_OUT].set(p["b2"])
    slab = slab.at[R_WH1:R_WH1 + HIDDEN + STATIC_OUT, :HEAD_HIDDEN].set(p["wh1"])
    slab = slab.at[R_BH1:R_BH1 + 1, :HEAD_HIDDEN].set(p["bh1"])
    slab = slab.at[R_WH2:R_WH2 + HEAD_HIDDEN, :OUTPUT_DIM].set(p["wh2"])
    slab = slab.at[R_BH2:R_BH2 + 1, :OUTPUT_DIM].set(p["bh2"])
    return slab


@jax.jit
def lstm_generic2_forward(input_seq, param_slab):
    """input_seq: (T, INPUT_DIM) f32, param_slab: (SLAB_ROWS, 128) f32
       -> (1, T, OUTPUT_DIM) f32 (matches PyTorch's (batch, seq, out))."""
    vmem = pl.BlockSpec(memory_space=pltpu.MemorySpace.VMEM)
    out_full = pl.pallas_call(
        lstm_generic2_kernel,
        out_shape=jax.ShapeDtypeStruct((T, LANES), jnp.float32),
        in_specs=[vmem, vmem],
        out_specs=vmem,
    )(input_seq, param_slab)
    # Padded lanes [OUTPUT_DIM:] are exactly zero (zero-padded wh2/bh2).
    return out_full[:, :OUTPUT_DIM].reshape(1, T, OUTPUT_DIM)
    # TODO(synk): for multi-sequence workloads, add a leading batch grid axis
    # with dimension_semantics=("parallel",) to use both TCs on v7x.


# ------------------------------ reference (JAX) -------------------------------
def reference_forward(input_seq, params):
    dyn = input_seq[:, :DYN]
    stat = input_seq[:, DYN:]
    h = jnp.zeros((1, HIDDEN), jnp.float32)
    c = jnp.zeros((1, HIDDEN), jnp.float32)
    outs = []
    for t in range(T):
        gates = dyn[t:t + 1] @ params["wih_t"] + h @ params["whh_t"] + params["b_l"]
        i = jax.nn.sigmoid(gates[:, 0:HIDDEN])
        f = jax.nn.sigmoid(gates[:, HIDDEN:2 * HIDDEN])
        g = jnp.tanh(gates[:, 2 * HIDDEN:3 * HIDDEN])
        o = jax.nn.sigmoid(gates[:, 3 * HIDDEN:4 * HIDDEN])
        c = f * c + i * g
        h = o * jnp.tanh(c)
        outs.append(h)
    lstm_out = jnp.concatenate(outs, axis=0)                          # (T, H)
    hid = _gelu(stat @ params["w1"] + params["b1"])
    fnn = _gelu(hid @ params["w2"] + params["b2"])
    sd = jnp.concatenate([lstm_out, fnn], axis=1)                     # (T, H+4)
    z = _gelu(sd @ params["wh1"] + params["bh1"])
    out = z @ params["wh2"] + params["bh2"]
    return out.reshape(1, T, OUTPUT_DIM)


# ------------------------------- param init ----------------------------------
def init_params(key):
    ks = jax.random.split(key, 12)

    def unif(k, shape, fan_in):
        bound = 1.0 / math.sqrt(fan_in)
        return jax.random.uniform(k, shape, jnp.float32, -bound, bound)

    # LSTM (gate order i, f, g, o), stored transposed (in, 4H)
    wih_t = unif(ks[0], (DYN, 4 * HIDDEN), HIDDEN)
    whh_t = unif(ks[1], (HIDDEN, 4 * HIDDEN), HIDDEN)
    b_ih = unif(ks[2], (1, 4 * HIDDEN), HIDDEN)
    b_hh = unif(ks[3], (1, 4 * HIDDEN), HIDDEN)

    # static_mlp: Linear(16, 32) -> GELU -> Linear(32, 4) -> GELU
    w1 = unif(ks[4], (STATIC_IN, MLP_HIDDEN), STATIC_IN)
    b1 = unif(ks[5], (1, MLP_HIDDEN), STATIC_IN)
    w2 = unif(ks[6], (MLP_HIDDEN, STATIC_OUT), MLP_HIDDEN)
    b2 = unif(ks[7], (1, STATIC_OUT), MLP_HIDDEN)

    # head: Linear(H + STATIC_OUT, H//2) -> GELU -> Linear(H//2, OUTPUT_DIM)
    wh1 = unif(ks[8], (HIDDEN + STATIC_OUT, HEAD_HIDDEN), HIDDEN + STATIC_OUT)
    bh1 = unif(ks[9], (1, HEAD_HIDDEN), HIDDEN + STATIC_OUT)
    wh2 = unif(ks[10], (HEAD_HIDDEN, OUTPUT_DIM), HEAD_HIDDEN)
    bh2 = unif(ks[11], (1, OUTPUT_DIM), HEAD_HIDDEN)

    return {
        "wih_t": wih_t,
        "whh_t": whh_t,
        "b_l": b_ih + b_hh,
        "w1": w1, "b1": b1, "w2": w2, "b2": b2,
        "wh1": wh1, "bh1": bh1,
        "wh2": wh2, "bh2": bh2,
    }


if __name__ == "__main__":
    key = jax.random.PRNGKey(0)
    k_params, k_x = jax.random.split(key)
    params = init_params(k_params)
    slab = pack_params(params)

    # 2-D input (T, input_dim) -> PyTorch path with batch_size = 1.
    x = jax.random.normal(k_x, (T, INPUT_DIM), jnp.float32)

    out = lstm_generic2_forward(x, slab)
    out = jax.block_until_ready(out)

    ref = reference_forward(x, params)
    assert out.shape == (1, T, OUTPUT_DIM)
    assert jnp.allclose(out, ref, atol=1e-4, rtol=1e-4), (
        f"mismatch: max abs diff {jnp.max(jnp.abs(out - ref))}")

    print("KERNEL_OK")
</pallas_src>

<mosaic_0001>
module attributes {stable_mosaic.version = 11 : i64} {
  func.func @lstm_generic2_kernel(%arg0: memref<8x20xf32, #tpu.memory_space<vmem>>, %arg1: memref<184x128xf32, #tpu.memory_space<vmem>>, %arg2: memref<8x128xf32, #tpu.memory_space<vmem>>) attributes {dimension_semantics = [], scalar_prefetch = 0 : i64, scratch_operands = 0 : i64, tpu.core_type = #tpu.core_type<tc>} {
    %c0 = arith.constant 0 : index
    %c0_0 = arith.constant 0 : index
    %0 = vector.load %arg1[%c0, %c0_0] : memref<184x128xf32, #tpu.memory_space<vmem>>, vector<4x128xf32>
    %c8 = arith.constant 8 : index
    %c0_1 = arith.constant 0 : index
    %1 = vector.load %arg1[%c8, %c0_1] : memref<184x128xf32, #tpu.memory_space<vmem>>, vector<32x128xf32>
    %c40 = arith.constant 40 : index
    %c0_2 = arith.constant 0 : index
    %2 = vector.load %arg1[%c40, %c0_2] : memref<184x128xf32, #tpu.memory_space<vmem>>, vector<1x128xf32>
    %c0_3 = arith.constant 0 : index
    %c0_4 = arith.constant 0 : index
    %3 = vector.load %arg0[%c0_3, %c0_4] : memref<8x20xf32, #tpu.memory_space<vmem>>, vector<8x4xf32>
    %cst = arith.constant dense<0.000000e+00> : vector<8x128xf32>
    %4 = tpu.matmul %3, %0, %cst {dimension_numbers = #tpu.dot_dimension_numbers<[1], [0], [0], [1], [0, 0, 1, 1], [], []>} : vector<8x4xf32>, vector<4x128xf32>, vector<8x128xf32> -> vector<8x128xf32>
    %5 = vector.broadcast %2 : vector<1x128xf32> to vector<8x128xf32>
    %6 = arith.addf %4, %5 : vector<8x128xf32>
    %cst_5 = arith.constant 0.000000e+00 : f32
    %7 = vector.broadcast %cst_5 : f32 to vector<1x32xf32>
    %cst_6 = arith.constant 0.000000e+00 : f32
    %8 = vector.broadcast %cst_6 : f32 to vector<1x32xf32>
    %9 = vector.extract_strided_slice %6 {offsets = [0, 0], sizes = [1, 128], strides = [1, 1]} : vector<8x128xf32> to vector<1x128xf32>
    %cst_7 = arith.constant dense<0.000000e+00> : vector<1x128xf32>
    %10 = tpu.matmul %7, %1, %cst_7 {dimension_numbers = #tpu.dot_dimension_numbers<[1], [0], [0], [1], [0, 0, 1, 1], [], []>} : vector<1x32xf32>, vector<32x128xf32>, vector<1x128xf32> -> vector<1x128xf32>
    %11 = arith.addf %9, %10 : vector<1x128xf32>
    %12 = arith.negf %11 : vector<1x128xf32>
    %13 = math.exp %12 : vector<1x128xf32>
    %cst_8 = arith.constant 1.000000e+00 : f32
    %14 = vector.broadcast %cst_8 : f32 to vector<1x128xf32>
    %15 = arith.addf %14, %13 : vector<1x128xf32>
    %16 = arith.divf %14, %15 : vector<1x128xf32>
    %17 = math.tanh %11 : vector<1x128xf32>
    %18 = vector.extract_strided_slice %16 {offsets = [0, 0], sizes = [1, 32], strides = [1, 1]} : vector<1x128xf32> to vector<1x32xf32>
    %19 = vector.extract_strided_slice %16 {offsets = [0, 32], sizes = [1, 32], strides = [1, 1]} : vector<1x128xf32> to vector<1x32xf32>
    %20 = vector.extract_strided_slice %16 {offsets = [0, 96], sizes = [1, 32], strides = [1, 1]} : vector<1x128xf32> to vector<1x32xf32>
    %21 = vector.extract_strided_slice %17 {offsets = [0, 64], sizes = [1, 32], strides = [1, 1]} : vector<1x128xf32> to vector<1x32xf32>
    %22 = arith.mulf %19, %8 : vector<1x32xf32>
    %23 = arith.mulf %18, %21 : vector<1x32xf32>
    %24 = arith.addf %22, %23 : vector<1x32xf32>
    %25 = math.tanh %24 : vector<1x32xf32>
    %26 = arith.mulf %20, %25 : vector<1x32xf32>
    %27 = vector.extract_strided_slice %6 {offsets = [1, 0], sizes = [1, 128], strides = [1, 1]} : vector<8x128xf32> to vector<1x128xf32>
    %cst_9 = arith.constant dense<0.000000e+00> : vector<1x128xf32>
    %28 = tpu.matmul %26, %1, %cst_9 {dimension_numbers = #tpu.dot_dimension_numbers<[1], [0], [0], [1], [0, 0, 1, 1], [], []>} : vector<1x32xf32>, vector<32x128xf32>, vector<1x128xf32> -> vector<1x128xf32>
    %29 = arith.addf %27, %28 : vector<1x128xf32>
    %30 = arith.negf %29 : vector<1x128xf32>
    %31 = math.exp %30 : vector<1x128xf32>
    %cst_10 = arith.constant 1.000000e+00 : f32
    %32 = vector.broadcast %cst_10 : f32 to vector<1x128xf32>
    %33 = arith.addf %32, %31 : vector<1x128xf32>
    %34 = arith.divf %32, %33 : vector<1x128xf32>
    %35 = math.tanh %29 : vector<1x128xf32>
    %36 = vector.extract_strided_slice %34 {offsets = [0, 0], sizes = [1, 32], strides = [1, 1]} : vector<1x128xf32> to vector<1x32xf32>
    %37 = vector.extract_strided_slice %34 {offsets = [0, 32], sizes = [1, 32], strides = [1, 1]} : vector<1x128xf32> to vector<1x32xf32>
    %38 = vector.extract_strided_slice %34 {offsets = [0, 96], sizes = [1, 32], strides = [1, 1]} : vector<1x128xf32> to vector<1x32xf32>
    %39 = vector.extract_strided_slice %35 {offsets = [0, 64], sizes = [1, 32], strides = [1, 1]} : vector<1x128xf32> to vector<1x32xf32>
    %40 = arith.mulf %37, %24 : vector<1x32xf32>
    %41 = arith.mulf %36, %39 : vector<1x32xf32>
    %42 = arith.addf %40, %41 : vector<1x32xf32>
    %43 = math.tanh %42 : vector<1x32xf32>
    %44 = arith.mulf %38, %43 : vector<1x32xf32>
    %45 = vector.extract_strided_slice %6 {offsets = [2, 0], sizes = [1, 128], strides = [1, 1]} : vector<8x128xf32> to vector<1x128xf32>
    %cst_11 = arith.constant dense<0.000000e+00> : vector<1x128xf32>
    %46 = tpu.matmul %44, %1, %cst_11 {dimension_numbers = #tpu.dot_dimension_numbers<[1], [0], [0], [1], [0, 0, 1, 1], [], []>} : vector<1x32xf32>, vector<32x128xf32>, vector<1x128xf32> -> vector<1x128xf32>
    %47 = arith.addf %45, %46 : vector<1x128xf32>
    %48 = arith.negf %47 : vector<1x128xf32>
    %49 = math.exp %48 : vector<1x128xf32>
    %cst_12 = arith.constant 1.000000e+00 : f32
    %50 = vector.broadcast %cst_12 : f32 to vector<1x128xf32>
    %51 = arith.addf %50, %49 : vector<1x128xf32>
    %52 = arith.divf %50, %51 : vector<1x128xf32>
    %53 = math.tanh %47 : vector<1x128xf32>
    %54 = vector.extract_strided_slice %52 {offsets = [0, 0], sizes = [1, 32], strides = [1, 1]} : vector<1x128xf32> to vector<1x32xf32>
    %55 = vector.extract_strided_slice %52 {offsets = [0, 32], sizes = [1, 32], strides = [1, 1]} : vector<1x128xf32> to vector<1x32xf32>
    %56 = vector.extract_strided_slice %52 {offsets = [0, 96], sizes = [1, 32], strides = [1, 1]} : vector<1x128xf32> to vector<1x32xf32>
    %57 = vector.extract_strided_slice %53 {offsets = [0, 64], sizes = [1, 32], strides = [1, 1]} : vector<1x128xf32> to vector<1x32xf32>
    %58 = arith.mulf %55, %42 : vector<1x32xf32>
    %59 = arith.mulf %54, %57 : vector<1x32xf32>
    %60 = arith.addf %58, %59 : vector<1x32xf32>
    %61 = math.tanh %60 : vector<1x32xf32>
    %62 = arith.mulf %56, %61 : vector<1x32xf32>
    %63 = vector.extract_strided_slice %6 {offsets = [3, 0], sizes = [1, 128], strides = [1, 1]} : vector<8x128xf32> to vector<1x128xf32>
    %cst_13 = arith.constant dense<0.000000e+00> : vector<1x128xf32>
    %64 = tpu.matmul %62, %1, %cst_13 {dimension_numbers = #tpu.dot_dimension_numbers<[1], [0], [0], [1], [0, 0, 1, 1], [], []>} : vector<1x32xf32>, vector<32x128xf32>, vector<1x128xf32> -> vector<1x128xf32>
    %65 = arith.addf %63, %64 : vector<1x128xf32>
    %66 = arith.negf %65 : vector<1x128xf32>
    %67 = math.exp %66 : vector<1x128xf32>
    %cst_14 = arith.constant 1.000000e+00 : f32
    %68 = vector.broadcast %cst_14 : f32 to vector<1x128xf32>
    %69 = arith.addf %68, %67 : vector<1x128xf32>
    %70 = arith.divf %68, %69 : vector<1x128xf32>
    %71 = math.tanh %65 : vector<1x128xf32>
    %72 = vector.extract_strided_slice %70 {offsets = [0, 0], sizes = [1, 32], strides = [1, 1]} : vector<1x128xf32> to vector<1x32xf32>
    %73 = vector.extract_strided_slice %70 {offsets = [0, 32], sizes = [1, 32], strides = [1, 1]} : vector<1x128xf32> to vector<1x32xf32>
    %74 = vector.extract_strided_slice %70 {offsets = [0, 96], sizes = [1, 32], strides = [1, 1]} : vector<1x128xf32> to vector<1x32xf32>
    %75 = vector.extract_strided_slice %71 {offsets = [0, 64], sizes = [1, 32], strides = [1, 1]} : vector<1x128xf32> to vector<1x32xf32>
    %76 = arith.mulf %73, %60 : vector<1x32xf32>
    %77 = arith.mulf %72, %75 : vector<1x32xf32>
    %78 = arith.addf %76, %77 : vector<1x32xf32>
    %79 = math.tanh %78 : vector<1x32xf32>
    %80 = arith.mulf %74, %79 : vector<1x32xf32>
    %81 = vector.extract_strided_slice %6 {offsets = [4, 0], sizes = [1, 128], strides = [1, 1]} : vector<8x128xf32> to vector<1x128xf32>
    %cst_15 = arith.constant dense<0.000000e+00> : vector<1x128xf32>
    %82 = tpu.matmul %80, %1, %cst_15 {dimension_numbers = #tpu.dot_dimension_numbers<[1], [0], [0], [1], [0, 0, 1, 1], [], []>} : vector<1x32xf32>, vector<32x128xf32>, vector<1x128xf32> -> vector<1x128xf32>
    %83 = arith.addf %81, %82 : vector<1x128xf32>
    %84 = arith.negf %83 : vector<1x128xf32>
    %85 = math.exp %84 : vector<1x128xf32>
    %cst_16 = arith.constant 1.000000e+00 : f32
    %86 = vector.broadcast %cst_16 : f32 to vector<1x128xf32>
    %87 = arith.addf %86, %85 : vector<1x128xf32>
    %88 = arith.divf %86, %87 : vector<1x128xf32>
    %89 = math.tanh %83 : vector<1x128xf32>
    %90 = vector.extract_strided_slice %88 {offsets = [0, 0], sizes = [1, 32], strides = [1, 1]} : vector<1x128xf32> to vector<1x32xf32>
    %91 = vector.extract_strided_slice %88 {offsets = [0, 32], sizes = [1, 32], strides = [1, 1]} : vector<1x128xf32> to vector<1x32xf32>
    %92 = vector.extract_strided_slice %88 {offsets = [0, 96], sizes = [1, 32], strides = [1, 1]} : vector<1x128xf32> to vector<1x32xf32>
    %93 = vector.extract_strided_slice %89 {offsets = [0, 64], sizes = [1, 32], strides = [1, 1]} : vector<1x128xf32> to vector<1x32xf32>
    %94 = arith.mulf %91, %78 : vector<1x32xf32>
    %95 = arith.mulf %90, %93 : vector<1x32xf32>
    %96 = arith.addf %94, %95 : vector<1x32xf32>
    %97 = math.tanh %96 : vector<1x32xf32>
    %98 = arith.mulf %92, %97 : vector<1x32xf32>
    %99 = vector.extract_strided_slice %6 {offsets = [5, 0], sizes = [1, 128], strides = [1, 1]} : vector<8x128xf32> to vector<1x128xf32>
    %cst_17 = arith.constant dense<0.000000e+00> : vector<1x128xf32>
    %100 = tpu.matmul %98, %1, %cst_17 {dimension_numbers = #tpu.dot_dimension_numbers<[1], [0], [0], [1], [0, 0, 1, 1], [], []>} : vector<1x32xf32>, vector<32x128xf32>, vector<1x128xf32> -> vector<1x128xf32>
    %101 = arith.addf %99, %100 : vector<1x128xf32>
    %102 = arith.negf %101 : vector<1x128xf32>
    %103 = math.exp %102 : vector<1x128xf32>
    %cst_18 = arith.constant 1.000000e+00 : f32
    %104 = vector.broadcast %cst_18 : f32 to vector<1x128xf32>
    %105 = arith.addf %104, %103 : vector<1x128xf32>
    %106 = arith.divf %104, %105 : vector<1x128xf32>
    %107 = math.tanh %101 : vector<1x128xf32>
    %108 = vector.extract_strided_slice %106 {offsets = [0, 0], sizes = [1, 32], strides = [1, 1]} : vector<1x128xf32> to vector<1x32xf32>
    %109 = vector.extract_strided_slice %106 {offsets = [0, 32], sizes = [1, 32], strides = [1, 1]} : vector<1x128xf32> to vector<1x32xf32>
    %110 = vector.extract_strided_slice %106 {offsets = [0, 96], sizes = [1, 32], strides = [1, 1]} : vector<1x128xf32> to vector<1x32xf32>
    %111 = vector.extract_strided_slice %107 {offsets = [0, 64], sizes = [1, 32], strides = [1, 1]} : vector<1x128xf32> to vector<1x32xf32>
    %112 = arith.mulf %109, %96 : vector<1x32xf32>
    %113 = arith.mulf %108, %111 : vector<1x32xf32>
    %114 = arith.addf %112, %113 : vector<1x32xf32>
    %115 = math.tanh %114 : vector<1x32xf32>
    %116 = arith.mulf %110, %115 : vector<1x32xf32>
    %117 = vector.extract_strided_slice %6 {offsets = [6, 0], sizes = [1, 128], strides = [1, 1]} : vector<8x128xf32> to vector<1x128xf32>
    %cst_19 = arith.constant dense<0.000000e+00> : vector<1x128xf32>
    %118 = tpu.matmul %116, %1, %cst_19 {dimension_numbers = #tpu.dot_dimension_numbers<[1], [0], [0], [1], [0, 0, 1, 1], [], []>} : vector<1x32xf32>, vector<32x128xf32>, vector<1x128xf32> -> vector<1x128xf32>
    %119 = arith.addf %117, %118 : vector<1x128xf32>
    %120 = arith.negf %119 : vector<1x128xf32>
    %121 = math.exp %120 : vector<1x128xf32>
    %cst_20 = arith.constant 1.000000e+00 : f32
    %122 = vector.broadcast %cst_20 : f32 to vector<1x128xf32>
    %123 = arith.addf %122, %121 : vector<1x128xf32>
    %124 = arith.divf %122, %123 : vector<1x128xf32>
    %125 = math.tanh %119 : vector<1x128xf32>
    %126 = vector.extract_strided_slice %124 {offsets = [0, 0], sizes = [1, 32], strides = [1, 1]} : vector<1x128xf32> to vector<1x32xf32>
    %127 = vector.extract_strided_slice %124 {offsets = [0, 32], sizes = [1, 32], strides = [1, 1]} : vector<1x128xf32> to vector<1x32xf32>
    %128 = vector.extract_strided_slice %124 {offsets = [0, 96], sizes = [1, 32], strides = [1, 1]} : vector<1x128xf32> to vector<1x32xf32>
    %129 = vector.extract_strided_slice %125 {offsets = [0, 64], sizes = [1, 32], strides = [1, 1]} : vector<1x128xf32> to vector<1x32xf32>
    %130 = arith.mulf %127, %114 : vector<1x32xf32>
    %131 = arith.mulf %126, %129 : vector<1x32xf32>
    %132 = arith.addf %130, %131 : vector<1x32xf32>
    %133 = math.tanh %132 : vector<1x32xf32>
    %134 = arith.mulf %128, %133 : vector<1x32xf32>
    %135 = vector.extract_strided_slice %6 {offsets = [7, 0], sizes = [1, 128], strides = [1, 1]} : vector<8x128xf32> to vector<1x128xf32>
    %cst_21 = arith.constant dense<0.000000e+00> : vector<1x128xf32>
    %136 = tpu.matmul %134, %1, %cst_21 {dimension_numbers = #tpu.dot_dimension_numbers<[1], [0], [0], [1], [0, 0, 1, 1], [], []>} : vector<1x32xf32>, vector<32x128xf32>, vector<1x128xf32> -> vector<1x128xf32>
    %137 = arith.addf %135, %136 : vector<1x128xf32>
    %138 = arith.negf %137 : vector<1x128xf32>
    %139 = math.exp %138 : vector<1x128xf32>
    %cst_22 = arith.constant 1.000000e+00 : f32
    %140 = vector.broadcast %cst_22 : f32 to vector<1x128xf32>
    %141 = arith.addf %140, %139 : vector<1x128xf32>
    %142 = arith.divf %140, %141 : vector<1x128xf32>
    %143 = math.tanh %137 : vector<1x128xf32>
    %144 = vector.extract_strided_slice %142 {offsets = [0, 0], sizes = [1, 32], strides = [1, 1]} : vector<1x128xf32> to vector<1x32xf32>
    %145 = vector.extract_strided_slice %142 {offsets = [0, 32], sizes = [1, 32], strides = [1, 1]} : vector<1x128xf32> to vector<1x32xf32>
    %146 = vector.extract_strided_slice %142 {offsets = [0, 96], sizes = [1, 32], strides = [1, 1]} : vector<1x128xf32> to vector<1x32xf32>
    %147 = vector.extract_strided_slice %143 {offsets = [0, 64], sizes = [1, 32], strides = [1, 1]} : vector<1x128xf32> to vector<1x32xf32>
    %148 = arith.mulf %145, %132 : vector<1x32xf32>
    %149 = arith.mulf %144, %147 : vector<1x32xf32>
    %150 = arith.addf %148, %149 : vector<1x32xf32>
    %151 = math.tanh %150 : vector<1x32xf32>
    %152 = arith.mulf %146, %151 : vector<1x32xf32>
    %153 = tpu.concatenate %26, %44, %62, %80, %98, %116, %134, %152 in 0 : vector<1x32xf32>, vector<1x32xf32>, vector<1x32xf32>, vector<1x32xf32>, vector<1x32xf32>, vector<1x32xf32>, vector<1x32xf32>, vector<1x32xf32> -> vector<8x32xf32>
    %c0_23 = arith.constant 0 : index
    %c4 = arith.constant 4 : index
    %154 = vector.load %arg0[%c0_23, %c4] : memref<8x20xf32, #tpu.memory_space<vmem>>, vector<8x16xf32>
    %c48 = arith.constant 48 : index
    %c0_24 = arith.constant 0 : index
    %155 = vector.load %arg1[%c48, %c0_24] : memref<184x128xf32, #tpu.memory_space<vmem>>, vector<16x32xf32>
    %c64 = arith.constant 64 : index
    %c0_25 = arith.constant 0 : index
    %156 = vector.load %arg1[%c64, %c0_25] : memref<184x128xf32, #tpu.memory_space<vmem>>, vector<1x32xf32>
    %c72 = arith.constant 72 : index
    %c0_26 = arith.constant 0 : index
    %157 = vector.load %arg1[%c72, %c0_26] : memref<184x128xf32, #tpu.memory_space<vmem>>, vector<32x4xf32>
    %c104 = arith.constant 104 : index
    %c0_27 = arith.constant 0 : index
    %158 = vector.load %arg1[%c104, %c0_27] : memref<184x128xf32, #tpu.memory_space<vmem>>, vector<1x4xf32>
    %cst_28 = arith.constant dense<0.000000e+00> : vector<8x32xf32>
    %159 = tpu.matmul %154, %155, %cst_28 {dimension_numbers = #tpu.dot_dimension_numbers<[1], [0], [0], [1], [0, 0, 1, 1], [], []>} : vector<8x16xf32>, vector<16x32xf32>, vector<8x32xf32> -> vector<8x32xf32>
    %160 = vector.broadcast %156 : vector<1x32xf32> to vector<8x32xf32>
    %161 = arith.addf %159, %160 : vector<8x32xf32>
    %cst_29 = arith.constant 5.000000e-01 : f32
    %162 = vector.broadcast %cst_29 : f32 to vector<8x32xf32>
    %163 = arith.mulf %162, %161 : vector<8x32xf32>
    %cst_30 = arith.constant 0.707106769 : f32
    %164 = vector.broadcast %cst_30 : f32 to vector<8x32xf32>
    %165 = arith.mulf %161, %164 : vector<8x32xf32>
    %166 = math.erf %165 : vector<8x32xf32>
    %cst_31 = arith.constant 1.000000e+00 : f32
    %167 = vector.broadcast %cst_31 : f32 to vector<8x32xf32>
    %168 = arith.addf %167, %166 : vector<8x32xf32>
    %169 = arith.mulf %163, %168 : vector<8x32xf32>
    %cst_32 = arith.constant dense<0.000000e+00> : vector<8x4xf32>
    %170 = tpu.matmul %169, %157, %cst_32 {dimension_numbers = #tpu.dot_dimension_numbers<[1], [0], [0], [1], [0, 0, 1, 1], [], []>} : vector<8x32xf32>, vector<32x4xf32>, vector<8x4xf32> -> vector<8x4xf32>
    %171 = vector.broadcast %158 : vector<1x4xf32> to vector<8x4xf32>
    %172 = arith.addf %170, %171 : vector<8x4xf32>
    %cst_33 = arith.constant 5.000000e-01 : f32
    %173 = vector.broadcast %cst_33 : f32 to vector<8x4xf32>
    %174 = arith.mulf %173, %172 : vector<8x4xf32>
    %cst_34 = arith.constant 0.707106769 : f32
    %175 = vector.broadcast %cst_34 : f32 to vector<8x4xf32>
    %176 = arith.mulf %172, %175 : vector<8x4xf32>
    %177 = math.erf %176 : vector<8x4xf32>
    %cst_35 = arith.constant 1.000000e+00 : f32
    %178 = vector.broadcast %cst_35 : f32 to vector<8x4xf32>
    %179 = arith.addf %178, %177 : vector<8x4xf32>
    %180 = arith.mulf %174, %179 : vector<8x4xf32>
    %c112 = arith.constant 112 : index
    %c0_36 = arith.constant 0 : index
    %181 = vector.load %arg1[%c112, %c0_36] : memref<184x128xf32, #tpu.memory_space<vmem>>, vector<32x16xf32>
    %c144 = arith.constant 144 : index
    %c0_37 = arith.constant 0 : index
    %182 = vector.load %arg1[%c144, %c0_37] : memref<184x128xf32, #tpu.memory_space<vmem>>, vector<4x16xf32>
    %c152 = arith.constant 152 : index
    %c0_38 = arith.constant 0 : index
    %183 = vector.load %arg1[%c152, %c0_38] : memref<184x128xf32, #tpu.memory_space<vmem>>, vector<1x16xf32>
    %cst_39 = arith.constant dense<0.000000e+00> : vector<8x16xf32>
    %184 = tpu.matmul %153, %181, %cst_39 {dimension_numbers = #tpu.dot_dimension_numbers<[1], [0], [0], [1], [0, 0, 1, 1], [], []>} : vector<8x32xf32>, vector<32x16xf32>, vector<8x16xf32> -> vector<8x16xf32>
    %cst_40 = arith.constant dense<0.000000e+00> : vector<8x16xf32>
    %185 = tpu.matmul %180, %182, %cst_40 {dimension_numbers = #tpu.dot_dimension_numbers<[1], [0], [0], [1], [0, 0, 1, 1], [], []>} : vector<8x4xf32>, vector<4x16xf32>, vector<8x16xf32> -> vector<8x16xf32>
    %186 = arith.addf %184, %185 : vector<8x16xf32>
    %187 = vector.broadcast %183 : vector<1x16xf32> to vector<8x16xf32>
    %188 = arith.addf %186, %187 : vector<8x16xf32>
    %cst_41 = arith.constant 5.000000e-01 : f32
    %189 = vector.broadcast %cst_41 : f32 to vector<8x16xf32>
    %190 = arith.mulf %189, %188 : vector<8x16xf32>
    %cst_42 = arith.constant 0.707106769 : f32
    %191 = vector.broadcast %cst_42 : f32 to vector<8x16xf32>
    %192 = arith.mulf %188, %191 : vector<8x16xf32>
    %193 = math.erf %192 : vector<8x16xf32>
    %cst_43 = arith.constant 1.000000e+00 : f32
    %194 = vector.broadcast %cst_43 : f32 to vector<8x16xf32>
    %195 = arith.addf %194, %193 : vector<8x16xf32>
    %196 = arith.mulf %190, %195 : vector<8x16xf32>
    %c160 = arith.constant 160 : index
    %c0_44 = arith.constant 0 : index
    %197 = vector.load %arg1[%c160, %c0_44] : memref<184x128xf32, #tpu.memory_space<vmem>>, vector<16x128xf32>
    %c176 = arith.constant 176 : index
    %c0_45 = arith.constant 0 : index
    %198 = vector.load %arg1[%c176, %c0_45] : memref<184x128xf32, #tpu.memory_space<vmem>>, vector<1x128xf32>
    %cst_46 = arith.constant dense<0.000000e+00> : vector<8x128xf32>
    %199 = tpu.matmul %196, %197, %cst_46 {dimension_numbers = #tpu.dot_dimension_numbers<[1], [0], [0], [1], [0, 0, 1, 1], [], []>} : vector<8x16xf32>, vector<16x128xf32>, vector<8x128xf32> -> vector<8x128xf32>
    %200 = vector.broadcast %198 : vector<1x128xf32> to vector<8x128xf32>
    %201 = arith.addf %199, %200 : vector<8x128xf32>
    %c0_47 = arith.constant 0 : index
    %c0_48 = arith.constant 0 : index
    %202 = vector.load %arg2[%c0_47, %c0_48] : memref<8x128xf32, #tpu.memory_space<vmem>>, vector<8x128xf32>
    tpu.vector_store %arg2[%c0_47, %c0_48], %201 {strides = array<i32>} : memref<8x128xf32, #tpu.memory_space<vmem>>, vector<8x128xf32>,
    return
  }
}

</mosaic_0001>

<bundles_post_ra>
// kernel: lstm_generic2_forward.1
= control target key start
LH: loop header
LB: loop body
LE: loop exit
PB: predicated region body
PF: predicated region fallthrough
CT: control target
= control target key end

     0   :  { %7 = vsyncpa [#allocation3], 0  ;;  %s2035_s0 = inlined_call_operand.hbm [shape: f32[8,20], index: 0, kind: input, shape index: {}]   ;;  %s2036_s1 = inlined_call_operand.hbm [shape: f32[184,128], index: 1, kind: input, shape index: {}]   ;;  %s2037_s2 = inlined_call_operand.vmem [shape: f32[8,128], index: 2, kind: output, shape index: {}]  }
   0x1   :  { %8 = vsyncpa [#allocation5], 0  ;;  %s1830_s9 = smov [#allocation2]   ;;  %s1831_s11 = smov [#allocation4]  }
   0x2   :  { %s15_s10 = sshll.u32 %s1830_s9, 4  ;;  %s24_s12 = sshll.u32 %s1831_s11, 4  ;;  %s16_s10 = int_to_ptr.vmem [resolvable:$true] %s15_s10  ;;  %s1855_s12 = int_to_ptr.vmem [resolvable:$true] %s24_s12 }
   0x3   :  { %s1782_s15 = scalar_lea.hbm %s2035_s0, 128 }
   0x4   :  { %p1783_p0 = scmp.ne.s32.totalorder %s2035_s0, %s1782_s15  ;;  %p1786_p1 = scmp.lt.u32.totalorder %s1782_s15, %s2035_s0 }
   0x6   :  { %p1788_p2 = pnand %p1786_p1, %p1783_p0 }
   0x8   :  { %1791 = shalt.err (!%p1788_p2)
}
   0x9   :  { %s1792_s20 = scalar_lea.vmem %s16_s10, 128  ;;  %p1797_p4 = scmp.lt.s32.totalorder %s16_s10, %s16_s10 }
   0xa   :  { %p1793_p3 = scmp.ne.s32.totalorder %s16_s10, %s1792_s20  ;;  %p1798_p5 = scmp.lt.s32.totalorder %s1792_s20, %s1792_s20 }
   0xc   :  { %p1799_p6 = por %p1798_p5, %p1797_p4 }
   0xe   :  { %p1800_p7 = pnand %p1799_p6, %p1793_p3 }
  0x10   :  { %1803 = shalt.err (!%p1800_p7)
}
  0x11   :  { %18 = dma.hbm_to_vmem [thread:$0]  %s2035_s0, 128, %s16_s10, [#allocation3]  }
  0x12   :  { %s1804_s25 = scalar_lea.hbm %s2036_s1, 2944 }
  0x13   :  { %p1805_p8 = scmp.ne.s32.totalorder %s2036_s1, %s1804_s25  ;;  %p1808_p9 = scmp.lt.u32.totalorder %s1804_s25, %s2036_s1 }
  0x15   :  { %p1810_p10 = pnand %p1808_p9, %p1805_p8 }
  0x17   :  { %1813 = shalt.err (!%p1810_p10)
}
  0x18   :  { %s1814_s30 = scalar_lea.vmem %s1855_s12, 2944  ;;  %p1819_p12 = scmp.lt.s32.totalorder %s1855_s12, %s1855_s12 }
  0x19   :  { %p1815_p11 = scmp.ne.s32.totalorder %s1855_s12, %s1814_s30  ;;  %p1820_p13 = scmp.lt.s32.totalorder %s1814_s30, %s1814_s30 }
  0x1b   :  { %p1821_p0 = por %p1820_p13, %p1819_p12 }
  0x1d   :  { %p1822_p1 = pnand %p1821_p0, %p1815_p11 }
  0x1f   :  { %1825 = shalt.err (!%p1822_p1)
}
  0x20   :  { %s1832_s0 = smov 128   ;;  %s1833_s3 = smov 8  }
  0x21   :  { %30 = dma.hbm_to_vmem [thread:$0]  %s2036_s1, 2944, %s1855_s12, [#allocation5], %s1832_s0, %s1832_s0, %s1833_s3  }
  0x22   :  { %1826 = dma.done.wait [#allocation3], 128  }
  0x23   :  { %1827 = vsyncadd [#allocation3], 4294967168 }
  0x24   :  { %1828 = dma.done.wait [#allocation5], 2944  }
  0x25   :  { %1829 = vsyncadd [#allocation5], 4294964352  ;;  %v1834_v0 = vmov 0.0|0.0   ;;  %v1835_v1 = vmov 0.0   ;;  %vm1836_vm0 = vmmov 0   ;;  %vm52_vm1 = vcmask 1043456  }
  0x26   :  { %1636 = vmatprep.subr.bf16.mxu1 %v1834_v0  ;;  %1502 = vmatprep.subr.mxu0 %v1835_v1  ;;  %vm48_vm2 = vcmask 31744   ;;  %v38_v2 = vld [vmem:[#allocation4 + $0x8] sm:$0xff]  ;;  %v39_v3 = vld [vmem:[#allocation4 + $0x10] sm:$0xff]  ;;  %v37_v4 = vld [vmem:[#allocation4] sm:$0xf]  ;;  %s1837_s1 = smov 64  }
  0x27   :  { %1504 = vmatprep.mubr.msk.f32.mxu0 %vm1836_vm0, %v1835_v1  ;;  %1515 = vmatprep.mubr.msk.f32.mxu1 %vm1836_vm0, %v1835_v1  ;;  %v1892_v5 = vpack.c.bf16 %v39_v3, %v38_v2  ;;  %v1895_v6 = vld [vmem:[#allocation2] sm:$0xff]  ;;  %v41_v8 = vld [vmem:[#allocation4 + $0x20] sm:$0xff]  ;;  %v1414_v12 = vld [vmem:[#allocation4 + $0x28] ss:$0 sm:$0xff]  ;;  %s1838_s6 = smov 32   ;;  %vm126_vm3 = vcmask 261120  }
  0x28   :  { %1503 = vmatpush3.msk.msra.mxu0 %vm52_vm1, %v37_v4  ;;  %v40_v7 = vld [vmem:[#allocation4 + $0x18] sm:$0xff]  ;;  %vm973_vm4 = vcmask 1040384   ;;  %vm975_vm5 = vcmask 1041408   ;;  %vm977_vm6 = vcmask 1042432   ;;  %vm980_vm7 = vcmask 1044480   ;;  %s1839_s7 = smov 124  }
  0x29   :  { %1505 = vmatmul.mubr.msk.f32.vlgmr.msra.gmra.mrb[0].mxu0 %vm48_vm2, %v1895_v6  ;;  %1642 = vmatprep.subr.bf16.mxu0 %v1834_v0  ;;  %v1901_v9 = vpack.c.bf16 %v41_v8, %v40_v7  ;;  %vm982_vm8 = vcmask 1045504   ;;  %vm1000_vm9 = vcmask 130048   ;;  %vm984_vm10 = vcmask 1046528  }
  0x2a   :  { %1638 = vmatpush3.bf16.msra.mxu1 %v1892_v5  ;;  %1644 = vmatpush3.bf16.msra.mxu0 %v1892_v5 }
  0x2b   :  { %1639 = vmatprep.subr.bf16.mxu1 %v1834_v0  ;;  %1645 = vmatprep.subr.bf16.mxu0 %v1834_v0 }
  0x2c   :  { %1526 = vmatprep.mubr.msk.f32.mxu0 %vm1836_vm0, %v1835_v1 }
  0x2e   :  { %1641 = vmatpush3.bf16.msra.mxu1 %v1901_v9  ;;  %1647 = vmatpush3.bf16.msra.mxu0 %v1901_v9 }
  0x2f   :  { %1648 = vmatprep.subr.bf16.mxu1 %v1834_v0  ;;  %1654 = vmatprep.subr.bf16.mxu0 %v1834_v0 }
  0x31   :  { %1516 = vmatmul.mubr.f32.vlgmr.msra.gmra.mrb[0].mxu1 %v1835_v1 }
  0x32   :  { %1650 = vmatpush3.bf16.msra.mxu1 %v1892_v5  ;;  %1537 = vmatprep.mubr.msk.f32.mxu1 %vm1836_vm0, %v1835_v1 }
  0x33   :  { %1651 = vmatprep.subr.bf16.mxu1 %v1834_v0 }
  0x36   :  { %1653 = vmatpush3.bf16.msra.mxu1 %v1901_v9 }
  0x37   :  { %1660 = vmatprep.subr.bf16.mxu1 %v1834_v0 }
  0xfc   :  { %v122_v10 = vpop.f32.mrb[0].mxu0 }
  0xfd   :  { %v1506_v11 = vpop.f32.mrb[1].mxu0  ;;  %v1919_v13 = vadd.f32 %v1414_v12, %v122_v10 }
 0x104   :  { %v196_v14 = vpop.f32.mrb[0].mxu1 }
 0x105   :  { %v200_v15 = vadd.f32 %v196_v14, %v1919_v13  ;;  %v1517_v16 = vpop.f32.mrb[1].mxu1 }
 0x107   :  { %1712 = vtanh.f32 %v200_v15  ;;  %v1417_v18 = vmul.f32 -1.442695, %v200_v15 }
 0x109   :  { %1714 = vpow2.f32 %v1417_v18 }
 0x111   :  { %v1713_v17 = vpop.eup %1712 }
 0x112   :  { %210 = vrot.lane.b32.xlu0 %v1713_v17, %s1837_s1 }
 0x113   :  { %v1715_v19 = vpop.eup %1714 }
 0x114   :  { %v204_v20 = vadd.f32 1.0, %v1715_v19 }
 0x116   :  { %1716 = vrcp.f32 %v204_v20 }
 0x120   :  { %v1717_v21 = vpop.eup %1716 }
 0x121   :  { %v208_v24 = vmul.f32 0.0, %v1717_v21 }
 0x184   :  { %v211_v22 = vpop.permute.xlu0 %210 }
 0x185   :  { %v213_v23 = vmul.f32 %v1717_v21, %v211_v22 }
 0x187   :  { %215 = vrot.lane.b32.xlu0 %v213_v23, %s1838_s6 }
 0x1f9   :  { %v216_v25 = vpop.permute.xlu0 %215 }
 0x1fa   :  { %v218_v26 = vadd.f32 %v216_v25, %v208_v24 }
 0x1fc   :  { %1718 = vtanh.f32 %v218_v26  ;;  %v312_v42 = vrot.slane %v218_v26, 7 }
 0x206   :  { %v1719_v27 = vpop.eup %1718 }
 0x207   :  { %221 = vrot.lane.b32.xlu1 %v1719_v27, %s1837_s1 }
 0x279   :  { %v222_v28 = vpop.permute.xlu1 %221 }
 0x27a   :  { %v1925_v29 = vmul.f32 %v1717_v21, %v222_v28 }
 0x27c   :  { %226 = vrot.lane.b32.xlu1 %v1925_v29, %s1838_s6 }
 0x2ee   :  { %v227_v30 = vpop.permute.xlu1 %226 }
 0x2ef   :  { %1527 = vmatmul.mubr.msk.f32.vlgmr.msra.gmra.mrb[2].mxu0 %vm126_vm3, %v227_v30 }
 0x2f0   :  { %1656 = vmatpush3.bf16.msra.mxu0 %v1892_v5  ;;  %1548 = vmatprep.mubr.msk.f32.mxu0 %vm1836_vm0, %v1835_v1 }
 0x2f1   :  { %1657 = vmatprep.subr.bf16.mxu0 %v1834_v0 }
 0x2f4   :  { %1659 = vmatpush3.bf16.msra.mxu0 %v1901_v9 }
 0x2f5   :  { %1666 = vmatprep.subr.bf16.mxu0 %v1834_v0 }
 0x3c2   :  { %v296_v31 = vpop.f32.mrb[2].mxu0 }
 0x3c3   :  { %v301_v32 = vrot.slane %v296_v31, 7  ;;  %v1528_v33 = vpop.f32.mrb[3].mxu0 }
 0x3c5   :  { %v303_v34 = vadd.f32 %v301_v32, %v1919_v13 }
 0x3c7   :  { %1720 = vtanh.f32 %v303_v34  ;;  %v1419_v36 = vmul.f32 -1.442695, %v303_v34 }
 0x3c9   :  { %1722 = vpow2.f32 %v1419_v36 }
 0x3d1   :  { %v1721_v35 = vpop.eup %1720 }
 0x3d2   :  { %316 = vrot.lane.b32.xlu0 %v1721_v35, %s1837_s1 }
 0x3d3   :  { %v1723_v37 = vpop.eup %1722 }
 0x3d4   :  { %v307_v38 = vadd.f32 1.0, %v1723_v37 }
 0x3d6   :  { %1724 = vrcp.f32 %v307_v38 }
 0x3e0   :  { %v1725_v39 = vpop.eup %1724 }
 0x3e1   :  { %v314_v43 = vmul.f32 %v1725_v39, %v312_v42 }
 0x444   :  { %v317_v40 = vpop.permute.xlu0 %316 }
 0x445   :  { %v319_v41 = vmul.f32 %v1725_v39, %v317_v40 }
 0x447   :  { %321 = vrot.lane.b32.xlu1 %v319_v41, %s1838_s6 }
 0x4b9   :  { %v322_v44 = vpop.permute.xlu1 %321 }
 0x4ba   :  { %v324_v45 = vadd.f32 %v322_v44, %v314_v43 }
 0x4bc   :  { %1726 = vtanh.f32 %v324_v45  ;;  %v419_v62 = vrot.slane %v324_v45, 7 }
 0x4c6   :  { %v1727_v46 = vpop.eup %1726 }
 0x4c7   :  { %327 = vrot.lane.b32.xlu0 %v1727_v46, %s1837_s1 }
 0x539   :  { %v328_v47 = vpop.permute.xlu0 %327 }
 0x53a   :  { %v330_v48 = vmul.f32 %v1725_v39, %v328_v47 }
 0x53c   :  { %v332_v49 = vrot.slane %v330_v48, 1  ;;  %v974_v10 = vsel %vm973_vm4, %v1925_v29, %v330_v48 }
 0x53e   :  { %333 = vrot.lane.b32.xlu1 %v332_v49, %s1838_s6 }
 0x5b0   :  { %v334_v50 = vpop.permute.xlu1 %333 }
 0x5b1   :  { %1538 = vmatmul.mubr.msk.f32.vlgmr.msra.gmra.mrb[2].mxu1 %vm126_vm3, %v334_v50 }
 0x5b2   :  { %1662 = vmatpush3.bf16.msra.mxu1 %v1892_v5  ;;  %1559 = vmatprep.mubr.msk.f32.mxu1 %vm1836_vm0, %v1835_v1 }
 0x5b3   :  { %1663 = vmatprep.subr.bf16.mxu1 %v1834_v0 }
 0x5b6   :  { %1665 = vmatpush3.bf16.msra.mxu1 %v1901_v9 }
 0x5b7   :  { %1672 = vmatprep.subr.bf16.mxu1 %v1834_v0 }
 0x684   :  { %v403_v51 = vpop.f32.mrb[2].mxu1 }
 0x685   :  { %v408_v52 = vrot.slane %v403_v51, 6  ;;  %v1539_v53 = vpop.f32.mrb[3].mxu1 }
 0x687   :  { %v410_v54 = vadd.f32 %v408_v52, %v1919_v13 }
 0x689   :  { %1728 = vtanh.f32 %v410_v54  ;;  %v1421_v56 = vmul.f32 -1.442695, %v410_v54 }
 0x68b   :  { %1730 = vpow2.f32 %v1421_v56 }
 0x693   :  { %v1729_v55 = vpop.eup %1728 }
 0x694   :  { %423 = vrot.lane.b32.xlu0 %v1729_v55, %s1837_s1 }
 0x695   :  { %v1731_v57 = vpop.eup %1730 }
 0x696   :  { %v414_v58 = vadd.f32 1.0, %v1731_v57 }
 0x698   :  { %1732 = vrcp.f32 %v414_v58 }
 0x6a2   :  { %v1733_v59 = vpop.eup %1732 }
 0x6a3   :  { %v421_v63 = vmul.f32 %v1733_v59, %v419_v62 }
 0x706   :  { %v424_v60 = vpop.permute.xlu0 %423 }
 0x707   :  { %v426_v61 = vmul.f32 %v1733_v59, %v424_v60 }
 0x709   :  { %428 = vrot.lane.b32.xlu1 %v426_v61, %s1838_s6 }
 0x77b   :  { %v429_v2 = vpop.permute.xlu1 %428 }
 0x77c   :  { %v431_v3 = vadd.f32 %v429_v2, %v421_v63 }
 0x77e   :  { %1734 = vtanh.f32 %v431_v3  ;;  %v526_v26 = vrot.slane %v431_v3, 7 }
 0x788   :  { %v1735_v4 = vpop.eup %1734 }
 0x789   :  { %434 = vrot.lane.b32.xlu0 %v1735_v4, %s1837_s1 }
 0x7fb   :  { %v435_v7 = vpop.permute.xlu0 %434 }
 0x7fc   :  { %v437_v8 = vmul.f32 %v1733_v59, %v435_v7 }
 0x7fe   :  { %v439_v11 = vrot.slane %v437_v8, 2  ;;  %v976_v12 = vsel %vm975_vm5, %v974_v10, %v437_v8 }
 0x800   :  { %440 = vrot.lane.b32.xlu1 %v439_v11, %s1838_s6 }
 0x872   :  { %v441_v14 = vpop.permute.xlu1 %440 }
 0x873   :  { %1549 = vmatmul.mubr.msk.f32.vlgmr.msra.gmra.mrb[4].mxu0 %vm126_vm3, %v441_v14 }
 0x874   :  { %1668 = vmatpush3.bf16.msra.mxu0 %v1892_v5  ;;  %1570 = vmatprep.mubr.msk.f32.mxu0 %vm1836_vm0, %v1835_v1 }
 0x875   :  { %1669 = vmatprep.subr.bf16.mxu0 %v1834_v0 }
 0x878   :  { %1671 = vmatpush3.bf16.msra.mxu0 %v1901_v9 }
 0x879   :  { %1678 = vmatprep.subr.bf16.mxu0 %v1834_v0 }
 0x946   :  { %v510_v15 = vpop.f32.mrb[4].mxu0 }
 0x947   :  { %v515_v16 = vrot.slane %v510_v15, 5  ;;  %v1550_v17 = vpop.f32.mrb[5].mxu0 }
 0x949   :  { %v517_v18 = vadd.f32 %v515_v16, %v1919_v13 }
 0x94b   :  { %1736 = vtanh.f32 %v517_v18  ;;  %v1423_v20 = vmul.f32 -1.442695, %v517_v18 }
 0x94d   :  { %1738 = vpow2.f32 %v1423_v20 }
 0x955   :  { %v1737_v19 = vpop.eup %1736 }
 0x956   :  { %530 = vrot.lane.b32.xlu0 %v1737_v19, %s1837_s1 }
 0x957   :  { %v1739_v21 = vpop.eup %1738 }
 0x958   :  { %v521_v22 = vadd.f32 1.0, %v1739_v21 }
 0x95a   :  { %1740 = vrcp.f32 %v521_v22 }
 0x964   :  { %v1741_v23 = vpop.eup %1740 }
 0x965   :  { %v528_v27 = vmul.f32 %v1741_v23, %v526_v26 }
 0x9c8   :  { %v531_v24 = vpop.permute.xlu0 %530 }
 0x9c9   :  { %v533_v25 = vmul.f32 %v1741_v23, %v531_v24 }
 0x9cb   :  { %535 = vrot.lane.b32.xlu1 %v533_v25, %s1838_s6 }
 0xa3d   :  { %v536_v28 = vpop.permute.xlu1 %535 }
 0xa3e   :  { %v538_v29 = vadd.f32 %v536_v28, %v528_v27 }
 0xa40   :  { %1742 = vtanh.f32 %v538_v29  ;;  %v633_v47 = vrot.slane %v538_v29, 7 }
 0xa4a   :  { %v1743_v30 = vpop.eup %1742 }
 0xa4b   :  { %541 = vrot.lane.b32.xlu0 %v1743_v30, %s1837_s1 }
 0xabd   :  { %v542_v31 = vpop.permute.xlu0 %541 }
 0xabe   :  { %v544_v32 = vmul.f32 %v1741_v23, %v542_v31 }
 0xac0   :  { %v546_v33 = vrot.slane %v544_v32, 3  ;;  %v978_v34 = vsel %vm977_vm6, %v976_v12, %v544_v32 }
 0xac2   :  { %547 = vrot.lane.b32.xlu1 %v546_v33, %s1838_s6 }
 0xb34   :  { %v548_v35 = vpop.permute.xlu1 %547 }
 0xb35   :  { %1560 = vmatmul.mubr.msk.f32.vlgmr.msra.gmra.mrb[4].mxu1 %vm126_vm3, %v548_v35  ;;  %v987_v35 = vld [vmem:[#allocation4 + $0x38] sm:$0xff] }
 0xb36   :  { %1674 = vmatpush3.bf16.msra.mxu1 %v1892_v5  ;;  %1581 = vmatprep.mubr.msk.f32.mxu1 %vm1836_vm0, %v1835_v1 }
 0xb37   :  { %1675 = vmatprep.subr.bf16.mxu1 %v1834_v0 }
 0xb3a   :  { %1677 = vmatpush3.bf16.msra.mxu1 %v1901_v9 }
 0xb3b   :  { %1684 = vmatprep.subr.bf16.mxu1 %v1834_v0 }
 0xc08   :  { %v617_v36 = vpop.f32.mrb[4].mxu1 }
 0xc09   :  { %v622_v37 = vrot.slane %v617_v36, 4  ;;  %v1561_v38 = vpop.f32.mrb[5].mxu1 }
 0xc0b   :  { %v624_v39 = vadd.f32 %v622_v37, %v1919_v13 }
 0xc0d   :  { %1744 = vtanh.f32 %v624_v39  ;;  %v1425_v41 = vmul.f32 -1.442695, %v624_v39 }
 0xc0f   :  { %1746 = vpow2.f32 %v1425_v41 }
 0xc17   :  { %v1745_v40 = vpop.eup %1744 }
 0xc18   :  { %637 = vrot.lane.b32.xlu0 %v1745_v40, %s1837_s1 }
 0xc19   :  { %v1747_v42 = vpop.eup %1746 }
 0xc1a   :  { %v628_v43 = vadd.f32 1.0, %v1747_v42 }
 0xc1c   :  { %1748 = vrcp.f32 %v628_v43 }
 0xc26   :  { %v1749_v44 = vpop.eup %1748 }
 0xc27   :  { %v635_v48 = vmul.f32 %v1749_v44, %v633_v47 }
 0xc8a   :  { %v638_v45 = vpop.permute.xlu0 %637 }
 0xc8b   :  { %v640_v46 = vmul.f32 %v1749_v44, %v638_v45 }
 0xc8d   :  { %642 = vrot.lane.b32.xlu1 %v640_v46, %s1838_s6  ;;  %v1432_v46 = vld [vmem:[#allocation4 + $0x40] ss:$0 sm:$0xff] }
 0xcff   :  { %v643_v49 = vpop.permute.xlu1 %642 }
 0xd00   :  { %v645_v50 = vadd.f32 %v643_v49, %v635_v48  ;;  %v989_v48 = vld [vmem:[#allocation4 + $0x48] sm:$0xff] }
 0xd02   :  { %1750 = vtanh.f32 %v645_v50 }
 0xd0c   :  { %v1751_v51 = vpop.eup %1750 }
 0xd0d   :  { %648 = vrot.lane.b32.xlu0 %v1751_v51, %s1837_s1  ;;  %v991_v51 = vld [vmem:[#allocation4 + $0x58] sm:$0xff] }
 0xd7f   :  { %v649_v52 = vpop.permute.xlu0 %648 }
 0xd80   :  { %v651_v53 = vmul.f32 %v1749_v44, %v649_v52  ;;  %v992_v52 = vld [vmem:[#allocation4 + $0x60] sm:$0xff] }
 0xd82   :  { %v653_v54 = vrot.slane %v651_v53, 4  ;;  %v979_v55 = vsel %vm52_vm1, %v978_v34, %v651_v53  ;;  %v986_v34 = vld [vmem:[#allocation4 + $0x30] sm:$0xff] }
 0xd83   :  { %v1685_v36 = vpack.c.bf16 %v987_v35, %v986_v34  ;;  %v1327_v34 = vld [vmem:[#allocation4 + $0xa0] sm:$0xff]  ;;  %v1328_v35 = vld [vmem:[#allocation4 + $0xa8] sm:$0xff] }
 0xd84   :  { %654 = vrot.lane.b32.xlu1 %v653_v54, %s1838_s6 }
 0xdf6   :  { %v655_v56 = vpop.permute.xlu1 %654 }
 0xdf7   :  { %1571 = vmatmul.mubr.msk.f32.vlgmr.msra.gmra.mrb[6].mxu0 %vm126_vm3, %v655_v56  ;;  %v1691_v56 = vpack.c.bf16 %v992_v52, %v991_v51 }
 0xdf8   :  { %1680 = vmatpush3.bf16.msra.mxu0 %v1892_v5  ;;  %1592 = vmatprep.mubr.msk.f32.mxu0 %vm1836_vm0, %v1835_v1 }
 0xdf9   :  { %1681 = vmatprep.subr.bf16.mxu0 %v1834_v0 }
 0xdfc   :  { %1683 = vmatpush3.bf16.msra.mxu0 %v1901_v9  ;;  %v740_v9 = vrot.slane %v645_v50, 7  ;;  %v990_v50 = vld [vmem:[#allocation4 + $0x50] sm:$0xff] }
 0xdfd   :  { %1687 = vmatprep.subr.bf16.mxu0 %v1834_v0  ;;  %v1688_v54 = vpack.c.bf16 %v990_v50, %v989_v48 }
 0xeca   :  { %v724_v57 = vpop.f32.mrb[6].mxu0 }
 0xecb   :  { %v729_v58 = vrot.slane %v724_v57, 3  ;;  %v1572_v59 = vpop.f32.mrb[7].mxu0 }
 0xecd   :  { %v731_v60 = vadd.f32 %v729_v58, %v1919_v13 }
 0xecf   :  { %1752 = vtanh.f32 %v731_v60  ;;  %v1427_v62 = vmul.f32 -1.442695, %v731_v60 }
 0xed1   :  { %1754 = vpow2.f32 %v1427_v62 }
 0xed9   :  { %v1753_v61 = vpop.eup %1752 }
 0xeda   :  { %744 = vrot.lane.b32.xlu0 %v1753_v61, %s1837_s1 }
 0xedb   :  { %v1755_v5 = vpop.eup %1754 }
 0xedc   :  { %v735_v63 = vadd.f32 1.0, %v1755_v5 }
 0xede   :  { %1756 = vrcp.f32 %v735_v63 }
 0xee8   :  { %v1757_v2 = vpop.eup %1756 }
 0xee9   :  { %v742_v7 = vmul.f32 %v1757_v2, %v740_v9 }
 0xf4c   :  { %v745_v3 = vpop.permute.xlu0 %744 }
 0xf4d   :  { %v747_v4 = vmul.f32 %v1757_v2, %v745_v3 }
 0xf4f   :  { %749 = vrot.lane.b32.xlu1 %v747_v4, %s1838_s6 }
 0xfc1   :  { %v750_v8 = vpop.permute.xlu1 %749 }
 0xfc2   :  { %v752_v10 = vadd.f32 %v750_v8, %v742_v7 }
 0xfc4   :  { %1758 = vtanh.f32 %v752_v10  ;;  %v847_v29 = vrot.slane %v752_v10, 7  ;;  %v1434_v10 = vld [vmem:[#allocation4 + $0x68] ss:$0 sm:$0xff] }
 0xfce   :  { %v1759_v11 = vpop.eup %1758 }
 0xfcf   :  { %755 = vrot.lane.b32.xlu0 %v1759_v11, %s1837_s1 }
0x1041   :  { %v756_v12 = vpop.permute.xlu0 %755 }
0x1042   :  { %v758_v14 = vmul.f32 %v1757_v2, %v756_v12  ;;  %v1164_v12 = vld [vmem:[#allocation4 + $0x90] sm:$0xf] }
0x1044   :  { %v760_v15 = vrot.slane %v758_v14, 5  ;;  %v981_v16 = vsel %vm980_vm7, %v979_v55, %v758_v14 }
0x1046   :  { %761 = vrot.lane.b32.xlu1 %v760_v15, %s1838_s6 }
0x10b8   :  { %v762_v17 = vpop.permute.xlu1 %761 }
0x10b9   :  { %1582 = vmatmul.mubr.msk.f32.vlgmr.msra.gmra.mrb[6].mxu1 %vm126_vm3, %v762_v17 }
0x10ba   :  { %1599 = vmatprep.mubr.msk.f32.mxu1 %vm1836_vm0, %v1835_v1  ;;  %1686 = vmatpush3.bf16.msra.mxu1 %v1685_v36  ;;  %v1700_v36 = vpack.c.bf16 %v1328_v35, %v1327_v34 }
0x10bb   :  { %1613 = vmatprep.subr.mxu1 %v1835_v1 }
0x118c   :  { %v831_v18 = vpop.f32.mrb[6].mxu1 }
0x118d   :  { %v836_v19 = vrot.slane %v831_v18, 2  ;;  %v1583_v20 = vpop.f32.mrb[7].mxu1 }
0x118e   :  { %v1161_v20 = vld [vmem:[#allocation4 + $0x78] sm:$0xff] }
0x118f   :  { %v838_v21 = vadd.f32 %v836_v19, %v1919_v13  ;;  %v1160_v19 = vld [vmem:[#allocation4 + $0x70] sm:$0xff] }
0x1191   :  { %1760 = vtanh.f32 %v838_v21  ;;  %v1429_v23 = vmul.f32 -1.442695, %v838_v21 }
0x1193   :  { %1762 = vpow2.f32 %v1429_v23  ;;  %v1694_v23 = vpack.c.bf16 %v1161_v20, %v1160_v19 }
0x119b   :  { %v1761_v22 = vpop.eup %1760 }
0x119c   :  { %851 = vrot.lane.b32.xlu0 %v1761_v22, %s1837_s1 }
0x119d   :  { %v1763_v24 = vpop.eup %1762 }
0x119e   :  { %v842_v25 = vadd.f32 1.0, %v1763_v24 }
0x11a0   :  { %1764 = vrcp.f32 %v842_v25  ;;  %v1162_v25 = vld [vmem:[#allocation4 + $0x80] sm:$0xff] }
0x11aa   :  { %v1765_v26 = vpop.eup %1764 }
0x11ab   :  { %v849_v30 = vmul.f32 %v1765_v26, %v847_v29 }
0x120e   :  { %v852_v27 = vpop.permute.xlu0 %851 }
0x120f   :  { %v854_v28 = vmul.f32 %v1765_v26, %v852_v27 }
0x1211   :  { %856 = vrot.lane.b32.xlu1 %v854_v28, %s1838_s6 }
0x1283   :  { %v857_v31 = vpop.permute.xlu1 %856 }
0x1284   :  { %v1997_v32 = vadd.f32 %v857_v31, %v849_v30 }
0x1286   :  { %1766 = vtanh.f32 %v1997_v32  ;;  %v954_v4 = vrot.slane %v1997_v32, 7 }
0x1290   :  { %v1767_v33 = vpop.eup %1766 }
0x1291   :  { %862 = vrot.lane.b32.xlu0 %v1767_v33, %s1837_s1 }
0x1295   :  { %998 = vrot.lane.b32.xlu0 %v1895_v6, %s1839_s7 }
0x1303   :  { %v863_v37 = vpop.permute.xlu0 %862 }
0x1304   :  { %v865_v38 = vmul.f32 %v1765_v26, %v863_v37  ;;  %v1163_v26 = vld [vmem:[#allocation4 + $0x88] sm:$0xff] }
0x1305   :  { %v1697_v27 = vpack.c.bf16 %v1163_v26, %v1162_v25 }
0x1306   :  { %v867_v39 = vrot.slane %v865_v38, 6  ;;  %v2003_v40 = vsel %vm982_vm8, %v981_v16, %v865_v38 }
0x1307   :  { %v999_v41 = vpop.permute.xlu0 %998 }
0x1308   :  { %868 = vrot.lane.b32.xlu1 %v867_v39, %s1838_s6  ;;  %1600 = vmatmul.mubr.msk.f32.vlgmr.msra.gmra.mrb[8].mxu1 %vm1000_vm9, %v999_v41 }
0x1309   :  { %1615 = vmatprep.mubr.msk.f32.mxu1 %vm1836_vm0, %v1835_v1  ;;  %1614 = vmatpush3.msk.msra.mxu1 %vm52_vm1, %v1164_v12 }
0x130a   :  { %1693 = vmatprep.subr.bf16.mxu1 %v1834_v0 }
0x137a   :  { %v869_v6 = vpop.permute.xlu1 %868 }
0x137b   :  { %1593 = vmatmul.mubr.msk.f32.vlgmr.msra.gmra.mrb[8].mxu0 %vm126_vm3, %v869_v6 }
0x137c   :  { %1610 = vmatprep.mubr.msk.f32.mxu0 %vm1836_vm0, %v1835_v1  ;;  %1689 = vmatpush3.bf16.msra.mxu0 %v1688_v54 }
0x137d   :  { %1690 = vmatprep.subr.bf16.mxu0 %v1834_v0 }
0x1380   :  { %1692 = vmatpush3.bf16.msra.mxu0 %v1691_v56 }
0x1381   :  { %1699 = vmatprep.subr.bf16.mxu0 %v1834_v0 }
0x13db   :  { %v1069_v47 = vpop.f32.mrb[8].mxu1 }
0x13dc   :  { %v1070_v49 = vadd.f32 %v1432_v46, %v1069_v47  ;;  %v1601_v53 = vpop.f32.mrb[9].mxu1 }
0x13de   :  { %v1074_v55 = vmul.f32 0.70710677, %v1070_v49  ;;  %v1073_v57 = vmul.f32 0.5, %v1070_v49 }
0x144e   :  { %v938_v42 = vpop.f32.mrb[8].mxu0 }
0x144f   :  { %v943_v43 = vrot.slane %v938_v42, 1  ;;  %v1594_v44 = vpop.f32.mrb[9].mxu0 }
0x1450   :  { %v1440_v44 = vld [vmem:[#allocation4 + $0xb0] ss:$0 sm:$0xff] }
0x1451   :  { %v945_v45 = vadd.f32 %v943_v43, %v1919_v13 }
0x1453   :  { %1768 = vtanh.f32 %v945_v45  ;;  %v1431_v61 = vmul.f32 -1.442695, %v945_v45 }
0x1454   :  { %1770 = verf.f32 %v1074_v55 }
0x1455   :  { %1772 = vpow2.f32 %v1431_v61 }
0x145d   :  { %v1769_v13 = vpop.eup %1768 }
0x145e   :  { %958 = vrot.lane.b32.xlu1 %v1769_v13, %s1837_s1  ;;  %v1771_v58 = vpop.eup %1770 }
0x145f   :  { %v1076_v59 = vadd.f32 1.0, %v1771_v58  ;;  %v1773_v62 = vpop.eup %1772 }
0x1460   :  { %v949_v5 = vadd.f32 1.0, %v1773_v62 }
0x1461   :  { %v1077_v60 = vmul.f32 %v1076_v59, %v1073_v57 }
0x1462   :  { %1774 = vrcp.f32 %v949_v5 }
0x1463   :  { %1611 = vmatmul.mubr.msk.f32.vlgmr.msra.gmra.mrb[10].mxu0 %vm126_vm3, %v1077_v60 }
0x1464   :  { %1633 = vmatprep.mubr.msk.f32.mxu0 %vm1836_vm0, %v1835_v1  ;;  %1701 = vmatpush3.bf16.msra.mxu0 %v1700_v36 }
0x146c   :  { %v1775_v63 = vpop.eup %1774 }
0x146d   :  { %v956_v9 = vmul.f32 %v1775_v63, %v954_v4 }
0x14d0   :  { %v959_v2 = vpop.permute.xlu1 %958 }
0x14d1   :  { %v961_v3 = vmul.f32 %v1775_v63, %v959_v2 }
0x14d3   :  { %963 = vrot.lane.b32.xlu0 %v961_v3, %s1838_s6 }
0x1536   :  { %v1151_v11 = vpop.f32.mrb[10].mxu0 }
0x1537   :  { %v1152_v14 = vadd.f32 %v1434_v10, %v1151_v11  ;;  %v1612_v15 = vpop.f32.mrb[11].mxu0 }
0x1539   :  { %v1156_v16 = vmul.f32 0.70710677, %v1152_v14  ;;  %v1155_v18 = vmul.f32 0.5, %v1152_v14 }
0x1545   :  { %v964_v7 = vpop.permute.xlu0 %963 }
0x1546   :  { %v966_v8 = vadd.f32 %v964_v7, %v956_v9 }
0x1548   :  { %1776 = vtanh.f32 %v966_v8 }
0x1549   :  { %1778 = verf.f32 %v1156_v16 }
0x1552   :  { %v1777_v17 = vpop.eup %1776 }
0x1553   :  { %969 = vrot.lane.b32.xlu1 %v1777_v17, %s1837_s1  ;;  %v1779_v21 = vpop.eup %1778 }
0x1554   :  { %v1158_v22 = vadd.f32 1.0, %v1779_v21 }
0x1556   :  { %v1159_v24 = vmul.f32 %v1158_v22, %v1155_v18 }
0x1558   :  { %1616 = vmatmul.mubr.msk.f32.vlgmr.msra.gmra.mrb[10].mxu1 %vm48_vm2, %v1159_v24 }
0x1559   :  { %1695 = vmatpush3.bf16.msra.mxu1 %v1694_v23  ;;  %1626 = vmatprep.mubr.msk.f32.mxu1 %vm1836_vm0, %v1835_v1  ;;  %v1439_v1 = vld [vmem:[#allocation4 + $0x98] ss:$0 sm:$0xff] }
0x155a   :  { %1696 = vmatprep.subr.bf16.mxu1 %v1834_v0 }
0x155d   :  { %1698 = vmatpush3.bf16.msra.mxu1 %v1697_v27 }
0x15c5   :  { %v970_v28 = vpop.permute.xlu1 %969 }
0x15c6   :  { %v972_v29 = vmul.f32 %v1775_v63, %v970_v28 }
0x15c8   :  { %v985_v30 = vsel %vm984_vm10, %v2003_v40, %v972_v29 }
0x15c9   :  { %1243 = vrot.lane.b32.xlu0 %v985_v30, %s1838_s6 }
0x162b   :  { %v1238_v31 = vpop.f32.mrb[10].mxu1 }
0x162c   :  { %v1617_v32 = vpop.f32.mrb[11].mxu1 }
0x163b   :  { %v1244_v33 = vpop.permute.xlu0 %1243 }
0x163c   :  { %1627 = vmatmul.mubr.msk.f32.vlgmr.msra.gmra.mrb[12].mxu1 %vm126_vm3, %v1244_v33 }
0x170f   :  { %v1313_v37 = vpop.f32.mrb[12].mxu1 }
0x1710   :  { %v1314_v0 = vadd.f32 %v1313_v37, %v1238_v31  ;;  %v1628_v38 = vpop.f32.mrb[13].mxu1 }
0x1712   :  { %v1321_v39 = vadd.f32 %v1439_v1, %v1314_v0 }
0x1714   :  { %v1323_v41 = vmul.f32 0.70710677, %v1321_v39  ;;  %v1322_v40 = vmul.f32 0.5, %v1321_v39 }
0x1716   :  { %1780 = verf.f32 %v1323_v41 }
0x1720   :  { %v1781_v6 = vpop.eup %1780 }
0x1721   :  { %v1325_v42 = vadd.f32 1.0, %v1781_v6 }
0x1723   :  { %v1326_v43 = vmul.f32 %v1325_v42, %v1322_v40 }
0x1725   :  { %1634 = vmatmul.mubr.msk.f32.vlgmr.msra.gmra.mrb[12].mxu0 %vm1000_vm9, %v1326_v43 }
0x17f8   :  { %v1403_v45 = vpop.f32.mrb[12].mxu0 }
0x17f9   :  { %v1404_v46 = vadd.f32 %v1440_v44, %v1403_v45  ;;  %v1635_v47 = vpop.f32.mrb[13].mxu0 }
0x17fb   :  { %1407 = vst [vmem:[%s2037_s2] sm:$0xff] %v1404_v46 }
0x17fc   :  { %1412 = vsyncpa [#allocation3], 1 }
0x17fd   :  { %1413 = vsyncpa [#allocation5], 1 }

</bundles_post_ra>
